<compile_context>
chip_gen: v5e
topology: v5e:2x2
jax: 0.10.0
libtpu: 0.0.40
codegen_flags: <defaults>
</compile_context>

<pallas_src>
import functools
import jax
import jax.numpy as jnp
from jax.experimental import pallas as pl
from jax.experimental.pallas import tpu as pltpu


# ----------------------------- Pallas kernels ------------------------------ #

def _encdec_kernel(p_ref, we_ref, be_ref, m_ref, tok_ref, wd_ref, bd_ref, o_ref):
    """Fused patch-embed + mask-token blend + 1x1-conv decoder for one row tile."""
    # Encoder: (tm, K) bf16 @ (K, Cp) bf16 -> f32 accumulate.
    z = jnp.dot(p_ref[...], we_ref[...], preferred_element_type=jnp.float32)
    z = z + be_ref[...]
    m = m_ref[...]                                   # (tm, 1), values in {0, 1}
    z = z + m * (tok_ref[...] - z)                   # mask-token blend
    # Decoder (1x1 conv == matmul over channels): (tm, Cp) @ (Cp, Np) + bias.
    y = jnp.dot(z.astype(wd_ref.dtype), wd_ref[...],
                preferred_element_type=jnp.float32)
    o_ref[...] = (y + bd_ref[...]).astype(o_ref.dtype)   # lane-dense bf16 store


def _loss_kernel(x_ref, xr_ref, m_ref, ah_ref, aw_ref, invc_ref, bes_ref,
                 eht_ref, ew_ref, part_ref):
    """norm_targets(47) + masked L1 partial sum for one (image, channel) pair.

    Blocks: x (1,1,H,W) f32, x_rec (1,1,H,W) bf16, coarse mask (1,Hm,Wm) f32,
    Ah (H,H), Aw (W,W), inv_cnt/bessel (H,W), EhT (Hm,H), Ew (W,Wm),
    output partial sum (1,1,8,128).
    """
    X = x_ref[0, 0]                                  # (H, W) f32
    Xr = xr_ref[0, 0].astype(jnp.float32)            # (H, W)
    Ah = ah_ref[...]                                 # (H, H) 0/1 band matrix (f32)
    Aw = aw_ref[...]                                 # (W, W) 0/1 band matrix (f32)
    inv_cnt = invc_ref[...]                          # (H, W)  1 / valid_count
    bessel = bes_ref[...]                            # (H, W)  count / (count - 1)

    # First-moment window sums on the bf16 MXU path (Ah/Aw exact in bf16, f32
    # accumulate); second moment (X^2) kept f32 to preserve var cancellation.
    x_bf = X.astype(jnp.bfloat16)
    rx = jnp.dot(x_bf, Aw.astype(jnp.bfloat16), preferred_element_type=jnp.float32)
    S = jnp.dot(Ah.astype(jnp.bfloat16), rx.astype(jnp.bfloat16),
                preferred_element_type=jnp.float32)
    rq = jnp.dot(X * X, Aw, preferred_element_type=jnp.float32)
    SQ = jnp.dot(Ah, rq, preferred_element_type=jnp.float32)

    mean = S * inv_cnt                               # count_include_pad=False
    var = (SQ * inv_cnt - mean * mean) * bessel
    var = jnp.maximum(var, 0.0)
    xn = (X - mean) * jax.lax.rsqrt(var + 1e-6)
    diff = jnp.abs(xn - Xr)                          # L1, reduction='none'

    # Masked sum with the COARSE mask:
    #   sum(diff * expand(m)) == sum((EhT @ diff @ Ew) * m)
    pooled = jnp.dot(jnp.dot(eht_ref[...], diff, preferred_element_type=jnp.float32),
                     ew_ref[...], preferred_element_type=jnp.float32)   # (Hm, Wm)
    total = jnp.sum(pooled * m_ref[0])

    # Lane-dense per-step partial sum (no cross-step accumulator -> safe under
    # "parallel"/megacore grid sharding); reduced in JAX afterwards.
    part_ref[...] = jnp.broadcast_to(total.reshape(1, 1, 1, 1), part_ref.shape)


# ------------------------------ JAX wrappers ------------------------------- #

def _round_up(v, mult):
    return (v + mult - 1) // mult * mult


def _vmem_budget_bytes():
    """Per-core VMEM limit: ~48 MiB on v7x (64 MiB/TC), ~96 MiB on v5e/v6e."""
    try:
        cap = int(pltpu.get_tpu_info().vmem_capacity_bytes)
    except Exception:
        cap = 64 * 1024 * 1024
    return int(min(max(cap * 3 // 4, 32 * 1024 * 1024), 96 * 1024 * 1024))


def _pick_row_tile(M, target):
    """Largest divisor of M <= target that is a multiple of 256/128/16 (bf16 packing)."""
    tm = max(1, min(M, target))
    for align in (256, 128, 16):
        t = (tm // align) * align
        while t >= align:
            if M % t == 0:
                return t
            t -= align
    t = tm
    while t > 1:
        if M % t == 0:
            return t
        t -= 1
    return M


def _mask_to_feature_grid(mask, mask_patch, es):
    """Map the (B, H/mp, W/mp) backbone-patch mask onto the (B, H/es, W/es) grid."""
    if es == mask_patch:
        return mask
    if es % mask_patch == 0:           # feature cell coarser than mask patch
        r = es // mask_patch
        B, Hm, Wm = mask.shape
        return mask.reshape(B, Hm // r, r, Wm // r, r).max(axis=(2, 4))
    assert mask_patch % es == 0        # mask patch coarser than feature cell
    r = mask_patch // es
    return jnp.repeat(jnp.repeat(mask, r, axis=1), r, axis=2)


def encdec_forward(x, mask_feat, params, es, *, row_tile=None, vmem_limit=None):
    """Fused encoder (stand-in backbone) + decoder. Returns x_rec (B, 3, H, W) bf16."""
    # TODO(synk): the real SimMIM backbone (Swin/ViT) is an external module;
    # a deterministic linear patch-embed + mask-token stand-in is used here.
    B, C_in, H, W = x.shape
    Hp, Wp = H // es, W // es
    K = C_in * es * es
    C = params["w_embed"].shape[1]
    N = params["w_dec"].shape[1]                     # es*es*3
    Cp = _round_up(C, 128)                           # lane-dense hidden width
    Np = _round_up(N, 128)                           # lane-dense output width
    M = B * Hp * Wp

    if vmem_limit is None:
        vmem_limit = _vmem_budget_bytes()
    if row_tile is None:
        row_tile = 512 if vmem_limit >= 96 * 1024 * 1024 else 256

    # Cast to bf16 BEFORE the patch-extraction transpose (halves its HBM bytes).
    patches = (x.astype(jnp.bfloat16)
                 .reshape(B, C_in, Hp, es, Wp, es)
                 .transpose(0, 2, 4, 1, 3, 5)
                 .reshape(M, K))
    m_flat = mask_feat.astype(jnp.float32).reshape(M, 1)

    # Zero-pad channel dims to 128 lanes: padded rows/cols contribute exactly 0.
    w_e = jnp.pad(params["w_embed"], ((0, 0), (0, Cp - C))).astype(jnp.bfloat16)
    b_e = jnp.pad(params["b_embed"], (0, Cp - C)).reshape(1, Cp)
    tok = jnp.pad(params["mask_token"], (0, Cp - C)).reshape(1, Cp)
    w_d = jnp.pad(params["w_dec"], ((0, Cp - C), (0, Np - N))).astype(jnp.bfloat16)
    b_d = jnp.pad(params["b_dec"], (0, Np - N)).reshape(1, Np)

    tm = _pick_row_tile(M, row_tile)

    # Grid-invariant operands are single-buffered (Buffered(1)): no dead VMEM.
    const_spec = lambda shape: pl.BlockSpec(shape, lambda i: (0,) * len(shape),
                                            pipeline_mode=pl.Buffered(1))

    y = pl.pallas_call(
        _encdec_kernel,
        out_shape=jax.ShapeDtypeStruct((M, Np), jnp.bfloat16),
        grid=(M // tm,),
        in_specs=[
            pl.BlockSpec((tm, K), lambda i: (i, 0)),      # pipelined row tile of patches
            const_spec((K, Cp)),                          # resident encoder weights
            const_spec((1, Cp)),                          # encoder bias
            pl.BlockSpec((tm, 1), lambda i: (i, 0)),      # per-row mask
            const_spec((1, Cp)),                          # mask token
            const_spec((Cp, Np)),                         # resident decoder weights
            const_spec((1, Np)),                          # decoder bias
        ],
        out_specs=pl.BlockSpec((tm, Np), lambda i: (i, 0)),
        compiler_params=pltpu.CompilerParams(
            dimension_semantics=("parallel",),
            vmem_limit_bytes=vmem_limit),
    )(patches, w_e, b_e, m_flat, tok, w_d, b_d)

    # Drop lane padding, then PixelShuffle(es) (now on bf16 -> half the bytes):
    #   channel k = c*es*es + i*es + j  ->  out[b, c, h*es + i, w*es + j]
    # TODO(synk): further fusion would do this rearrangement inside the loss
    # kernel and skip the x_rec HBM round-trip entirely.
    y = y[:, :N].reshape(B, Hp, Wp, 3, es, es)
    x_rec = y.transpose(0, 3, 1, 4, 2, 5).reshape(B, 3, Hp * es, Wp * es)
    return x_rec


def masked_l1_norm_numerator(x, x_rec, mask_coarse, mask_patch, norm_patch,
                             *, vmem_limit=None):
    """sum over all pixels/channels of |norm_targets(x,47) - x_rec| * expand(mask)."""
    assert norm_patch % 2 == 1
    B, C, H, W = x.shape
    _, Hm, Wm = mask_coarse.shape
    if vmem_limit is None:
        vmem_limit = _vmem_budget_bytes()

    pad = norm_patch // 2
    idx_h = jnp.arange(H)
    idx_w = jnp.arange(W)
    Ah = (jnp.abs(idx_h[:, None] - idx_h[None, :]) <= pad).astype(jnp.float32)
    Aw = (jnp.abs(idx_w[:, None] - idx_w[None, :]) <= pad).astype(jnp.float32)
    cnt = Ah.sum(axis=1)[:, None] * Aw.sum(axis=1)[None, :]   # valid counts (H, W)
    inv_cnt = 1.0 / cnt
    bessel = cnt / jnp.maximum(cnt - 1.0, 1.0)                # guard cnt == 1

    # 0/1 pooling matrices mapping pixel rows/cols -> coarse mask cells.
    EhT = (idx_h[None, :] // mask_patch == jnp.arange(Hm)[:, None]).astype(jnp.float32)
    Ew = (idx_w[:, None] // mask_patch == jnp.arange(Wm)[None, :]).astype(jnp.float32)

    const2 = lambda shape: pl.BlockSpec(shape, lambda b, c: (0, 0),
                                        pipeline_mode=pl.Buffered(1))

    part = pl.pallas_call(
        _loss_kernel,
        out_shape=jax.ShapeDtypeStruct((B, C, 8, 128), jnp.float32),
        grid=(B, C),                                          # both TCs busy on v7x
        in_specs=[
            pl.BlockSpec((1, 1, H, W), lambda b, c: (b, c, 0, 0)),
            pl.BlockSpec((1, 1, H, W), lambda b, c: (b, c, 0, 0)),
            pl.BlockSpec((1, Hm, Wm), lambda b, c: (b, 0, 0)),  # coarse mask, shared by C
            const2((H, H)),                                     # resident band matrices
            const2((W, W)),
            const2((H, W)),                                     # 1 / count
            const2((H, W)),                                     # Bessel factor
            const2((Hm, H)),                                    # pooling matrices
            const2((W, Wm)),
        ],
        out_specs=pl.BlockSpec((1, 1, 8, 128), lambda b, c: (b, c, 0, 0)),
        compiler_params=pltpu.CompilerParams(
            dimension_semantics=("parallel", "parallel"),
            vmem_limit_bytes=vmem_limit),
    )(x, x_rec, mask_coarse, Ah, Aw, inv_cnt, bessel, EhT, Ew)
    return part[:, :, 0, 0].sum()


def simmim_forward(params, x, mask, *, es, mask_patch, in_chans, row_tile=None):
    vmem_limit = _vmem_budget_bytes()

    # Mask at backbone-patch granularity -> encoder-stride feature grid.
    mask_feat = _mask_to_feature_grid(mask, mask_patch, es)           # (B, Hp, Wp)
    x_rec = encdec_forward(x, mask_feat, params, es,
                           row_tile=row_tile, vmem_limit=vmem_limit)

    mask_f = mask.astype(jnp.float32)                                 # coarse (B, Hm, Wm)
    num = masked_l1_norm_numerator(x, x_rec, mask_f, mask_patch, 47,
                                   vmem_limit=vmem_limit)
    # sum of the repeat_interleaved pixel mask == coarse sum * mask_patch**2.
    denom = mask_f.sum() * float(mask_patch * mask_patch) + 1e-5
    loss = num / denom / in_chans
    return loss


# --------------------------------- driver ---------------------------------- #

if __name__ == "__main__":
    B, in_chans, H, W = 2, 3, 16, 16
    es = 4                 # encoder_stride
    C = 32                 # backbone.num_features
    mask_patch = 4         # self.patch_size (mask granularity)

    key = jax.random.PRNGKey(0)
    k1, k2, k3, k4, k5 = jax.random.split(key, 5)

    x = jax.random.normal(k1, (B, in_chans, H, W), dtype=jnp.float32)
    mask = (jax.random.uniform(k2, (B, H // mask_patch, W // mask_patch)) > 0.5
            ).astype(jnp.float32)

    params = {
        "w_embed": 0.02 * jax.random.normal(k3, (in_chans * es * es, C), jnp.float32),
        "b_embed": jnp.zeros((C,), jnp.float32),
        "mask_token": 0.02 * jax.random.normal(k4, (C,), jnp.float32),
        "w_dec": 0.02 * jax.random.normal(k5, (C, es * es * 3), jnp.float32),
        "b_dec": jnp.zeros((es * es * 3,), jnp.float32),
    }

    # row_tile=16 exercises the multi-step pipelined grid even at this toy size
    # (at real SimMIM shapes the auto default of 256/512 is used instead).
    fwd = jax.jit(functools.partial(simmim_forward, es=es, mask_patch=mask_patch,
                                    in_chans=in_chans, row_tile=16))
    loss = fwd(params, x, mask)
    jax.block_until_ready(loss)
    assert loss.shape == () and bool(jnp.isfinite(loss))
    print("KERNEL_OK")
</pallas_src>

<mosaic_0001>
module attributes {stable_mosaic.version = 11 : i64} {
  func.func @_encdec_kernel(%arg0: i32, %arg1: memref<16x48xbf16, #tpu.memory_space<vmem>>, %arg2: memref<48x128xbf16, #tpu.memory_space<vmem>>, %arg3: memref<1x128xf32, #tpu.memory_space<vmem>>, %arg4: memref<16x1xf32, #tpu.memory_space<vmem>>, %arg5: memref<1x128xf32, #tpu.memory_space<vmem>>, %arg6: memref<128x128xbf16, #tpu.memory_space<vmem>>, %arg7: memref<1x128xf32, #tpu.memory_space<vmem>>, %arg8: memref<16x128xbf16, #tpu.memory_space<vmem>>) attributes {dimension_semantics = [#tpu.dimension_semantics<parallel>], iteration_bounds = array<i64: 2>, scalar_prefetch = 0 : i64, scratch_operands = 0 : i64, tpu.core_type = #tpu.core_type<tc>, window_params = [{transform_indices = @transform_0, window_bounds = array<i64: 16, 48>}, {pipeline_mode = #tpu.pipeline_mode<synchronous>, transform_indices = @transform_1, window_bounds = array<i64: 48, 128>}, {pipeline_mode = #tpu.pipeline_mode<synchronous>, transform_indices = @transform_2, window_bounds = array<i64: 1, 128>}, {transform_indices = @transform_3, window_bounds = array<i64: 16, 1>}, {pipeline_mode = #tpu.pipeline_mode<synchronous>, transform_indices = @transform_4, window_bounds = array<i64: 1, 128>}, {pipeline_mode = #tpu.pipeline_mode<synchronous>, transform_indices = @transform_5, window_bounds = array<i64: 128, 128>}, {pipeline_mode = #tpu.pipeline_mode<synchronous>, transform_indices = @transform_6, window_bounds = array<i64: 1, 128>}, {transform_indices = @transform_7, window_bounds = array<i64: 16, 128>}]} {
    %c0 = arith.constant 0 : index
    %c0_0 = arith.constant 0 : index
    %0 = vector.load %arg1[%c0, %c0_0] : memref<16x48xbf16, #tpu.memory_space<vmem>>, vector<16x48xbf16>
    %c0_1 = arith.constant 0 : index
    %c0_2 = arith.constant 0 : index
    %1 = vector.load %arg2[%c0_1, %c0_2] : memref<48x128xbf16, #tpu.memory_space<vmem>>, vector<48x128xbf16>
    %cst = arith.constant dense<0.000000e+00> : vector<16x128xf32>
    %2 = tpu.matmul %0, %1, %cst {dimension_numbers = #tpu.dot_dimension_numbers<[1], [0], [0], [1], [0, 0, 1, 1], [], []>} : vector<16x48xbf16>, vector<48x128xbf16>, vector<16x128xf32> -> vector<16x128xf32>
    %c0_3 = arith.constant 0 : index
    %c0_4 = arith.constant 0 : index
    %3 = vector.load %arg3[%c0_3, %c0_4] : memref<1x128xf32, #tpu.memory_space<vmem>>, vector<1x128xf32>
    %4 = vector.broadcast %3 : vector<1x128xf32> to vector<16x128xf32>
    %5 = arith.addf %2, %4 : vector<16x128xf32>
    %c0_5 = arith.constant 0 : index
    %c0_6 = arith.constant 0 : index
    %6 = vector.load %arg4[%c0_5, %c0_6] : memref<16x1xf32, #tpu.memory_space<vmem>>, vector<16x1xf32>
    %c0_7 = arith.constant 0 : index
    %c0_8 = arith.constant 0 : index
    %7 = vector.load %arg5[%c0_7, %c0_8] : memref<1x128xf32, #tpu.memory_space<vmem>>, vector<1x128xf32>
    %8 = vector.broadcast %7 : vector<1x128xf32> to vector<16x128xf32>
    %9 = arith.subf %8, %5 : vector<16x128xf32>
    %10 = vector.broadcast %6 : vector<16x1xf32> to vector<16x128xf32>
    %11 = arith.mulf %10, %9 : vector<16x128xf32>
    %12 = arith.addf %5, %11 : vector<16x128xf32>
    %13 = arith.truncf %12 : vector<16x128xf32> to vector<16x128xbf16>
    %c0_9 = arith.constant 0 : index
    %c0_10 = arith.constant 0 : index
    %14 = vector.load %arg6[%c0_9, %c0_10] : memref<128x128xbf16, #tpu.memory_space<vmem>>, vector<128x128xbf16>
    %cst_11 = arith.constant dense<0.000000e+00> : vector<16x128xf32>
    %15 = tpu.matmul %13, %14, %cst_11 {dimension_numbers = #tpu.dot_dimension_numbers<[1], [0], [0], [1], [0, 0, 1, 1], [], []>} : vector<16x128xbf16>, vector<128x128xbf16>, vector<16x128xf32> -> vector<16x128xf32>
    %c0_12 = arith.constant 0 : index
    %c0_13 = arith.constant 0 : index
    %16 = vector.load %arg7[%c0_12, %c0_13] : memref<1x128xf32, #tpu.memory_space<vmem>>, vector<1x128xf32>
    %17 = vector.broadcast %16 : vector<1x128xf32> to vector<16x128xf32>
    %18 = arith.addf %15, %17 : vector<16x128xf32>
    %19 = arith.truncf %18 : vector<16x128xf32> to vector<16x128xbf16>
    %c0_14 = arith.constant 0 : index
    %c0_15 = arith.constant 0 : index
    %20 = vector.load %arg8[%c0_14, %c0_15] : memref<16x128xbf16, #tpu.memory_space<vmem>>, vector<16x128xbf16>
    tpu.vector_store %arg8[%c0_14, %c0_15], %19 {strides = array<i32>} : memref<16x128xbf16, #tpu.memory_space<vmem>>, vector<16x128xbf16>,
    return
  }
  func.func @transform_0(%arg0: i32) -> (i32, i32) {
    %c0_i32 = arith.constant 0 : i32
    %c0_i32_0 = arith.constant 0 : i32
    return %arg0, %c0_i32 : i32, i32
  }
  func.func @transform_1(%arg0: i32) -> (i32, i32) {
    %c0_i32 = arith.constant 0 : i32
    %c0_i32_0 = arith.constant 0 : i32
    %c0_i32_1 = arith.constant 0 : i32
    return %c0_i32, %c0_i32_0 : i32, i32
  }
  func.func @transform_2(%arg0: i32) -> (i32, i32) {
    %c0_i32 = arith.constant 0 : i32
    %c0_i32_0 = arith.constant 0 : i32
    %c0_i32_1 = arith.constant 0 : i32
    return %c0_i32, %c0_i32_0 : i32, i32
  }
  func.func @transform_3(%arg0: i32) -> (i32, i32) {
    %c0_i32 = arith.constant 0 : i32
    %c0_i32_0 = arith.constant 0 : i32
    return %arg0, %c0_i32 : i32, i32
  }
  func.func @transform_4(%arg0: i32) -> (i32, i32) {
    %c0_i32 = arith.constant 0 : i32
    %c0_i32_0 = arith.constant 0 : i32
    %c0_i32_1 = arith.constant 0 : i32
    return %c0_i32, %c0_i32_0 : i32, i32
  }
  func.func @transform_5(%arg0: i32) -> (i32, i32) {
    %c0_i32 = arith.constant 0 : i32
    %c0_i32_0 = arith.constant 0 : i32
    %c0_i32_1 = arith.constant 0 : i32
    return %c0_i32, %c0_i32_0 : i32, i32
  }
  func.func @transform_6(%arg0: i32) -> (i32, i32) {
    %c0_i32 = arith.constant 0 : i32
    %c0_i32_0 = arith.constant 0 : i32
    %c0_i32_1 = arith.constant 0 : i32
    return %c0_i32, %c0_i32_0 : i32, i32
  }
  func.func @transform_7(%arg0: i32) -> (i32, i32) {
    %c0_i32 = arith.constant 0 : i32
    %c0_i32_0 = arith.constant 0 : i32
    return %arg0, %c0_i32 : i32, i32
  }
}

module attributes {stable_mosaic.version = 11 : i64} {
  func.func @_loss_kernel(%arg0: i32, %arg1: i32, %arg2: memref<1x1x16x16xf32, #tpu.memory_space<vmem>>, %arg3: memref<1x1x16x16xbf16, #tpu.memory_space<vmem>>, %arg4: memref<1x4x4xf32, #tpu.memory_space<vmem>>, %arg5: memref<16x16xf32, #tpu.memory_space<vmem>>, %arg6: memref<16x16xf32, #tpu.memory_space<vmem>>, %arg7: memref<16x16xf32, #tpu.memory_space<vmem>>, %arg8: memref<16x16xf32, #tpu.memory_space<vmem>>, %arg9: memref<4x16xf32, #tpu.memory_space<vmem>>, %arg10: memref<16x4xf32, #tpu.memory_space<vmem>>, %arg11: memref<1x1x8x128xf32, #tpu.memory_space<vmem>>) attributes {dimension_semantics = [#tpu.dimension_semantics<parallel>, #tpu.dimension_semantics<parallel>], iteration_bounds = array<i64: 2, 3>, scalar_prefetch = 0 : i64, scratch_operands = 0 : i64, tpu.core_type = #tpu.core_type<tc>, window_params = [{transform_indices = @transform_0, window_bounds = array<i64: 1, 1, 16, 16>}, {transform_indices = @transform_1, window_bounds = array<i64: 1, 1, 16, 16>}, {transform_indices = @transform_2, window_bounds = array<i64: 1, 4, 4>}, {pipeline_mode = #tpu.pipeline_mode<synchronous>, transform_indices = @transform_3, window_bounds = array<i64: 16, 16>}, {pipeline_mode = #tpu.pipeline_mode<synchronous>, transform_indices = @transform_4, window_bounds = array<i64: 16, 16>}, {pipeline_mode = #tpu.pipeline_mode<synchronous>, transform_indices = @transform_5, window_bounds = array<i64: 16, 16>}, {pipeline_mode = #tpu.pipeline_mode<synchronous>, transform_indices = @transform_6, window_bounds = array<i64: 16, 16>}, {pipeline_mode = #tpu.pipeline_mode<synchronous>, transform_indices = @transform_7, window_bounds = array<i64: 4, 16>}, {pipeline_mode = #tpu.pipeline_mode<synchronous>, transform_indices = @transform_8, window_bounds = array<i64: 16, 4>}, {transform_indices = @transform_9, window_bounds = array<i64: 1, 1, 8, 128>}]} {
    %c0 = arith.constant 0 : index
    %c0_0 = arith.constant 0 : index
    %c0_1 = arith.constant 0 : index
    %c0_2 = arith.constant 0 : index
    %0 = vector.load %arg2[%c0, %c0_0, %c0_1, %c0_2] : memref<1x1x16x16xf32, #tpu.memory_space<vmem>>, vector<1x1x16x16xf32>
    %1 = vector.shape_cast %0 : vector<1x1x16x16xf32> to vector<16x16xf32>
    %c0_3 = arith.constant 0 : index
    %c0_4 = arith.constant 0 : index
    %c0_5 = arith.constant 0 : index
    %c0_6 = arith.constant 0 : index
    %2 = vector.load %arg3[%c0_3, %c0_4, %c0_5, %c0_6] : memref<1x1x16x16xbf16, #tpu.memory_space<vmem>>, vector<1x1x16x16xbf16>
    %3 = vector.shape_cast %2 : vector<1x1x16x16xbf16> to vector<16x16xbf16>
    %4 = arith.extf %3 : vector<16x16xbf16> to vector<16x16xf32>
    %c0_7 = arith.constant 0 : index
    %c0_8 = arith.constant 0 : index
    %5 = vector.load %arg5[%c0_7, %c0_8] : memref<16x16xf32, #tpu.memory_space<vmem>>, vector<16x16xf32>
    %c0_9 = arith.constant 0 : index
    %c0_10 = arith.constant 0 : index
    %6 = vector.load %arg6[%c0_9, %c0_10] : memref<16x16xf32, #tpu.memory_space<vmem>>, vector<16x16xf32>
    %c0_11 = arith.constant 0 : index
    %c0_12 = arith.constant 0 : index
    %7 = vector.load %arg7[%c0_11, %c0_12] : memref<16x16xf32, #tpu.memory_space<vmem>>, vector<16x16xf32>
    %c0_13 = arith.constant 0 : index
    %c0_14 = arith.constant 0 : index
    %8 = vector.load %arg8[%c0_13, %c0_14] : memref<16x16xf32, #tpu.memory_space<vmem>>, vector<16x16xf32>
    %9 = arith.truncf %1 : vector<16x16xf32> to vector<16x16xbf16>
    %10 = arith.truncf %6 : vector<16x16xf32> to vector<16x16xbf16>
    %cst = arith.constant dense<0.000000e+00> : vector<16x16xf32>
    %11 = tpu.matmul %9, %10, %cst {dimension_numbers = #tpu.dot_dimension_numbers<[1], [0], [0], [1], [0, 0, 1, 1], [], []>} : vector<16x16xbf16>, vector<16x16xbf16>, vector<16x16xf32> -> vector<16x16xf32>
    %12 = arith.truncf %5 : vector<16x16xf32> to vector<16x16xbf16>
    %13 = arith.truncf %11 : vector<16x16xf32> to vector<16x16xbf16>
    %cst_15 = arith.constant dense<0.000000e+00> : vector<16x16xf32>
    %14 = tpu.matmul %12, %13, %cst_15 {dimension_numbers = #tpu.dot_dimension_numbers<[1], [0], [0], [1], [0, 0, 1, 1], [], []>} : vector<16x16xbf16>, vector<16x16xbf16>, vector<16x16xf32> -> vector<16x16xf32>
    %15 = arith.mulf %1, %1 : vector<16x16xf32>
    %cst_16 = arith.constant dense<0.000000e+00> : vector<16x16xf32>
    %16 = tpu.matmul %15, %6, %cst_16 {dimension_numbers = #tpu.dot_dimension_numbers<[1], [0], [0], [1], [0, 0, 1, 1], [], []>} : vector<16x16xf32>, vector<16x16xf32>, vector<16x16xf32> -> vector<16x16xf32>
    %cst_17 = arith.constant dense<0.000000e+00> : vector<16x16xf32>
    %17 = tpu.matmul %5, %16, %cst_17 {dimension_numbers = #tpu.dot_dimension_numbers<[1], [0], [0], [1], [0, 0, 1, 1], [], []>} : vector<16x16xf32>, vector<16x16xf32>, vector<16x16xf32> -> vector<16x16xf32>
    %18 = arith.mulf %14, %7 : vector<16x16xf32>
    %19 = arith.mulf %17, %7 : vector<16x16xf32>
    %20 = arith.mulf %18, %18 : vector<16x16xf32>
    %21 = arith.subf %19, %20 : vector<16x16xf32>
    %22 = arith.mulf %21, %8 : vector<16x16xf32>
    %cst_18 = arith.constant 0.000000e+00 : f32
    %23 = vector.broadcast %cst_18 : f32 to vector<16x16xf32>
    %24 = arith.maximumf %22, %23 : vector<16x16xf32>
    %25 = arith.subf %1, %18 : vector<16x16xf32>
    %cst_19 = arith.constant 9.99999997E-7 : f32
    %26 = vector.broadcast %cst_19 : f32 to vector<16x16xf32>
    %27 = arith.addf %24, %26 : vector<16x16xf32>
    %28 = math.rsqrt %27 : vector<16x16xf32>
    %29 = arith.mulf %25, %28 : vector<16x16xf32>
    %30 = arith.subf %29, %4 : vector<16x16xf32>
    %31 = math.absf %30 : vector<16x16xf32>
    %c0_20 = arith.constant 0 : index
    %c0_21 = arith.constant 0 : index
    %32 = vector.load %arg9[%c0_20, %c0_21] : memref<4x16xf32, #tpu.memory_space<vmem>>, vector<4x16xf32>
    %cst_22 = arith.constant dense<0.000000e+00> : vector<4x16xf32>
    %33 = tpu.matmul %32, %31, %cst_22 {dimension_numbers = #tpu.dot_dimension_numbers<[1], [0], [0], [1], [0, 0, 1, 1], [], []>} : vector<4x16xf32>, vector<16x16xf32>, vector<4x16xf32> -> vector<4x16xf32>
    %c0_23 = arith.constant 0 : index
    %c0_24 = arith.constant 0 : index
    %34 = vector.load %arg10[%c0_23, %c0_24] : memref<16x4xf32, #tpu.memory_space<vmem>>, vector<16x4xf32>
    %cst_25 = arith.constant dense<0.000000e+00> : vector<4x4xf32>
    %35 = tpu.matmul %33, %34, %cst_25 {dimension_numbers = #tpu.dot_dimension_numbers<[1], [0], [0], [1], [0, 0, 1, 1], [], []>} : vector<4x16xf32>, vector<16x4xf32>, vector<4x4xf32> -> vector<4x4xf32>
    %c0_26 = arith.constant 0 : index
    %c0_27 = arith.constant 0 : index
    %c0_28 = arith.constant 0 : index
    %36 = vector.load %arg4[%c0_26, %c0_27, %c0_28] : memref<1x4x4xf32, #tpu.memory_space<vmem>>, vector<1x4x4xf32>
    %37 = vector.shape_cast %36 : vector<1x4x4xf32> to vector<4x4xf32>
    %38 = arith.mulf %35, %37 : vector<4x4xf32>
    %39 = vector.shape_cast %38 : vector<4x4xf32> to vector<1x4x4xf32>
    %cst_29 = arith.constant dense<0.000000e+00> : vector<1xf32>
    %40 = vector.multi_reduction <add>, %39, %cst_29 [1, 2] : vector<1x4x4xf32> to vector<1xf32>
    %41 = vector.shape_cast %40 : vector<1xf32> to vector<1x1x1xf32>
    %42 = vector.extract %41[0, 0, 0] : f32 from vector<1x1x1xf32>
    %43 = vector.broadcast %42 : f32 to vector<1x1x1x1xf32>
    %44 = vector.shape_cast %43 : vector<1x1x1x1xf32> to vector<1x1x1x1xf32>
    %45 = vector.broadcast %44 : vector<1x1x1x1xf32> to vector<1x1x8x128xf32>
    %c0_30 = arith.constant 0 : index
    %c0_31 = arith.constant 0 : index
    %c0_32 = arith.constant 0 : index
    %c0_33 = arith.constant 0 : index
    %46 = vector.load %arg11[%c0_30, %c0_31, %c0_32, %c0_33] : memref<1x1x8x128xf32, #tpu.memory_space<vmem>>, vector<1x1x8x128xf32>
    tpu.vector_store %arg11[%c0_30, %c0_31, %c0_32, %c0_33], %45 {strides = array<i32>} : memref<1x1x8x128xf32, #tpu.memory_space<vmem>>, vector<1x1x8x128xf32>,
    return
  }
  func.func @transform_0(%arg0: i32, %arg1: i32) -> (i32, i32, i32, i32) {
    %c0_i32 = arith.constant 0 : i32
    %c0_i32_0 = arith.constant 0 : i32
    %c0_i32_1 = arith.constant 0 : i32
    return %arg0, %arg1, %c0_i32, %c0_i32_0 : i32, i32, i32, i32
  }
  func.func @transform_1(%arg0: i32, %arg1: i32) -> (i32, i32, i32, i32) {
    %c0_i32 = arith.constant 0 : i32
    %c0_i32_0 = arith.constant 0 : i32
    %c0_i32_1 = arith.constant 0 : i32
    return %arg0, %arg1, %c0_i32, %c0_i32_0 : i32, i32, i32, i32
  }
  func.func @transform_2(%arg0: i32, %arg1: i32) -> (i32, i32, i32) {
    %c0_i32 = arith.constant 0 : i32
    %c0_i32_0 = arith.constant 0 : i32
    %c0_i32_1 = arith.constant 0 : i32
    return %arg0, %c0_i32, %c0_i32_0 : i32, i32, i32
  }
  func.func @transform_3(%arg0: i32, %arg1: i32) -> (i32, i32) {
    %c0_i32 = arith.constant 0 : i32
    %c0_i32_0 = arith.constant 0 : i32
    %c0_i32_1 = arith.constant 0 : i32
    return %c0_i32, %c0_i32_0 : i32, i32
  }
  func.func @transform_4(%arg0: i32, %arg1: i32) -> (i32, i32) {
    %c0_i32 = arith.constant 0 : i32
    %c0_i32_0 = arith.constant 0 : i32
    %c0_i32_1 = arith.constant 0 : i32
    return %c0_i32, %c0_i32_0 : i32, i32
  }
  func.func @transform_5(%arg0: i32, %arg1: i32) -> (i32, i32) {
    %c0_i32 = arith.constant 0 : i32
    %c0_i32_0 = arith.constant 0 : i32
    %c0_i32_1 = arith.constant 0 : i32
    return %c0_i32, %c0_i32_0 : i32, i32
  }
  func.func @transform_6(%arg0: i32, %arg1: i32) -> (i32, i32) {
    %c0_i32 = arith.constant 0 : i32
    %c0_i32_0 = arith.constant 0 : i32
    %c0_i32_1 = arith.constant 0 : i32
    return %c0_i32, %c0_i32_0 : i32, i32
  }
  func.func @transform_7(%arg0: i32, %arg1: i32) -> (i32, i32) {
    %c0_i32 = arith.constant 0 : i32
    %c0_i32_0 = arith.constant 0 : i32
    %c0_i32_1 = arith.constant 0 : i32
    return %c0_i32, %c0_i32_0 : i32, i32
  }
  func.func @transform_8(%arg0: i32, %arg1: i32) -> (i32, i32) {
    %c0_i32 = arith.constant 0 : i32
    %c0_i32_0 = arith.constant 0 : i32
    %c0_i32_1 = arith.constant 0 : i32
    return %c0_i32, %c0_i32_0 : i32, i32
  }
  func.func @transform_9(%arg0: i32, %arg1: i32) -> (i32, i32, i32, i32) {
    %c0_i32 = arith.constant 0 : i32
    %c0_i32_0 = arith.constant 0 : i32
    %c0_i32_1 = arith.constant 0 : i32
    return %arg0, %arg1, %c0_i32, %c0_i32_0 : i32, i32, i32, i32
  }
}

</mosaic_0001>

<bundles_post_ra>
// kernel: simmim_forward.2
= control target key start
LH: loop header
LB: loop body
LE: loop exit
PB: predicated region body
PF: predicated region fallthrough
CT: control target
= control target key end

     0   :  { %s676_s24 = smov 0   ;;  %s746_s0 = inlined_call_operand.vmem [shape: bf16[32,48], index: 0, kind: input, shape index: {}]   ;;  %s747_s1 = inlined_call_operand.vmem [shape: bf16[48,128], index: 1, kind: input, shape index: {}]   ;;  %s748_s2 = inlined_call_operand.vmem [shape: f32[1,128], index: 2, kind: input, shape index: {}]   ;;  %s749_s3 = inlined_call_operand.vmem [shape: f32[32,1], index: 3, kind: input, shape index: {}]   ;;  %s750_s4 = inlined_call_operand.vmem [shape: f32[1,128], index: 4, kind: input, shape index: {}]   ;;  %s751_s5 = inlined_call_operand.vmem [shape: bf16[128,128], index: 5, kind: input, shape index: {}]   ;;  %s752_s6 = inlined_call_operand.vmem [shape: f32[1,128], index: 6, kind: input, shape index: {}]   ;;  %s753_s7 = inlined_call_operand.vmem [shape: bf16[32,128], index: 7, kind: output, shape index: {}]  }
   0x1 LB: > { %s535_s25 = sadd.s32 4294967295, %s633_s24   ;;  %p539_p0 = scmp.ge.s32.totalorder %s633_s24, 1  ;;  %s633_s24 = sphi %s676_s24, %s17_s24  }
   0x2   : > { %p249_p1 = scmp.lt.s32.totalorder %s633_s24, 3 }
   0x4   : > { %p250_p2 = pnand %p539_p0, %p249_p1 }
   0x5   : > { %s540_s28 = sshll.u32 (!%p250_p2), %s535_s25, 1 }
   0x6   : > { %253 = sbr.rel (%p250_p2) target bundleno = 306 (0x132), region = 48  ;;  %p287_p3 = scmp.lt.s32.totalorder (!%p250_p2), %s540_s28, 3 }
   0xb   : > { %v600_v0 = vld [vmem:[%s747_s1 + $0x10] sm:$0xff]  ;;  %v599_v1 = vld [vmem:[%s747_s1 + $0x8] sm:$0xff]  ;;  %v635_v2 = vmov 0   ;;  %v608_v3 = vld [vmem:[%s751_s5 + $0x38] sm:$0xff]  ;;  %s755_s28 = smov (!%p287_p3, %s540_s28), 3  ;;  %vm340_vm0 = vcmask 392192  }
   0xc   : > { %623 = vset.pattern.permute.xlu0 %v635_v2  ;;  %349 = vmatpush.bf16.msra.mxu0 %v600_v0  ;;  %v607_v4 = vld [vmem:[%s751_s5 + $0x30] sm:$0xff]  ;;  %s541_s12 = sshll.u32 %s755_s28, 2  ;;  %s543_s13 = sshll.u32 %s755_s28, 3  ;;  %v598_v5 = vld [vmem:[%s747_s1] sm:$0xff]  ;;  %v606_v7 = vld [vmem:[%s751_s5 + $0x28] sm:$0xff] }
   0xd   : > { %449 = vmatpush.bf16.msra.mxu1 %v608_v3  ;;  %s290_s18 = scalar_lea.vmem %s746_s0, %s541_s12  ;;  %s296_s21 = scalar_lea.vmem %s749_s3, %s543_s13  ;;  %v605_v10 = vld [vmem:[%s751_s5 + $0x20] sm:$0xff]  ;;  %v604_v11 = vld [vmem:[%s751_s5 + $0x18] sm:$0xff]  ;;  %v603_v12 = vld [vmem:[%s751_s5 + $0x10] sm:$0xff] }
   0xe   : > { %v358_v6 = vld [vmem:[%s296_s21] sm:$0xff]  ;;  %v359_v9 = vld [vmem:[%s296_s21 + $0x8] sm:$0xff]  ;;  %s302_s22 = scalar_lea.vmem %s753_s7, %s541_s12 }
   0xf   : > { %368 = vperm.xlu0 %623, %v358_v6   ;;  %v597_v8 = vld [vmem:[%s290_s18] sm:$0xff]  ;;  %v602_v13 = vld [vmem:[%s751_s5 + $0x8] sm:$0xff] }
  0x10   : > { %350 = vmatpush.bf16.msra.mxu0 %v599_v1  ;;  %v601_v14 = vld [vmem:[%s751_s5] sm:$0xff] }
  0x11   : > { %450 = vmatpush.bf16.msra.mxu1 %v607_v4  ;;  %v624_v15 = vld [vmem:[%s748_s2] ss:$0 sm:$0xff] }
  0x12   : > { %v625_v19 = vld [vmem:[%s750_s4] ss:$0 sm:$0xff] }
  0x13   : > { %v626_v31 = vld [vmem:[%s752_s6] ss:$0 sm:$0xff] }
  0x14   : > { %351 = vmatpush.bf16.msra.mxu0 %v598_v5 }
  0x15   : > { %451 = vmatpush.bf16.msra.mxu1 %v606_v7 }
  0x17   : > { %562 = vmatmul.msk.bf16.vlgmr.msra.gmra.mxu0 %vm340_vm0, %v597_v8  ;;  %373 = vperm.xlu0 %623, %v359_v9  }
  0x19   : > { %452 = vmatpush.bf16.msra.mxu1 %v605_v10 }
  0x1d   : > { %453 = vmatpush.bf16.msra.mxu1 %v604_v11 }
  0x21   : > { %454 = vmatpush.bf16.msra.mxu1 %v603_v12 }
  0x25   : > { %455 = vmatpush.bf16.msra.mxu1 %v602_v13 }
  0x29   : > { %456 = vmatpush.bf16.msra.mxu1 %v601_v14 }
  0x81   : > { %v369_v17 = vpop.permute.xlu0 %368 }
  0x89   : > { %v374_v25 = vpop.permute.xlu0 %373 }
  0x94   : > { %v353_v16 = vpop.f32.mrf.mxu0 }
  0x95   : > { %v354_v18 = vadd.f32 %v624_v15, %v353_v16 }
  0x97   : > { %v364_v20 = vsub.f32 %v625_v19, %v354_v18 }
  0x99   : > { %v376_v23 = vmul.f32 %v369_v17, %v364_v20 }
  0x9b   : > { %v378_v27 = vadd.f32 %v376_v23, %v354_v18 }
  0x9c   : > { %v355_v21 = vpop.f32.mrf.mxu0 }
  0x9d   : > { %v356_v22 = vadd.f32 %v624_v15, %v355_v21 }
  0x9f   : > { %v365_v24 = vsub.f32 %v625_v19, %v356_v22 }
  0xa1   : > { %v377_v26 = vmul.f32 %v374_v25, %v365_v24 }
  0xa3   : > { %v379_v28 = vadd.f32 %v377_v26, %v356_v22 }
  0xa5   : > { %v380_v29 = vpack.c.bf16 %v379_v28, %v378_v27 }
  0xa7   : > { %457 = vmatmul.bf16.vlgmr.msra.gmra.mxu1 %v380_v29 }
 0x124   : > { %v458_v30 = vpop.f32.mrf.mxu1 }
 0x125   : > { %v459_v33 = vadd.f32 %v626_v31, %v458_v30 }
 0x12c   : > { %v460_v32 = vpop.f32.mrf.mxu1 }
 0x12d   : > { %v461_v34 = vadd.f32 %v626_v31, %v460_v32 }
 0x12f   : > { %v612_v35 = vpack.c.bf16 %v461_v34, %v459_v33 }
 0x131   : > { %613 = vst [vmem:[%s302_s22] sm:$0xff] %v612_v35  }
 0x132 PF: > { %s17_s24 = sadd.s32 1, %s633_s24  }
 0x133   : > { %p14_p4 = scmp.ge.s32.totalorder %s17_s24, 4  }
 0x135   :  { %16 = sbr.rel (!%p14_p4) target bundleno = 1 (0x1), region = 81 }

// kernel: simmim_forward.3
= control target key start
LH: loop header
LB: loop body
LE: loop exit
PB: predicated region body
PF: predicated region fallthrough
CT: control target
= control target key end

     0   :  { %s923_s30 = smov 0   ;;  %s925_s10 = smov 0   ;;  %s1046_s0 = inlined_call_operand.vmem [shape: f32[2,3,16,16], index: 0, kind: input, shape index: {}]   ;;  %s1047_s1 = inlined_call_operand.vmem [shape: bf16[2,3,16,16], index: 1, kind: input, shape index: {}]   ;;  %s1048_s2 = inlined_call_operand.vmem [shape: f32[2,4,4], index: 2, kind: input, shape index: {}]   ;;  %s1049_s3 = inlined_call_operand.vmem [shape: f32[16,16], index: 3, kind: input, shape index: {}, may-alias: {3,4}]   ;;  %s1050_s4 = inlined_call_operand.vmem [shape: f32[16,16], index: 4, kind: input, shape index: {}, may-alias: {3,4}]   ;;  %s1051_s5 = inlined_call_operand.vmem [shape: f32[16,16], index: 5, kind: input, shape index: {}]   ;;  %s1052_s6 = inlined_call_operand.vmem [shape: f32[16,16], index: 6, kind: input, shape index: {}]   ;;  %s1053_s7 = inlined_call_operand.vmem [shape: f32[4,16], index: 7, kind: input, shape index: {}]   ;;  %s1054_s8 = inlined_call_operand.vmem [shape: f32[16,4], index: 8, kind: input, shape index: {}]   ;;  %s1055_s9 = inlined_call_operand.vmem [shape: f32[2,3,8,128], index: 9, kind: output, shape index: {}]  }
   0x1   :  { %s927_s11 = smov 0   ;;  %s929_s12 = smov 0  }
   0x2   :  { %s931_s13 = smov 0  }
   0x3 LB: > { %s28_s14 = sadd.s32 1, %s863_s11  ;;  %s31_s15 = sadd.s32 1, %s867_s12  ;;  %s871_s13 = sphi %s931_s13, %s19_s13   ;;  %s867_s12 = sphi %s929_s12, %s1059_s12   ;;  %s863_s11 = sphi %s927_s11, %s1058_s11   ;;  %s859_s10 = sphi %s925_s10, %s1057_s10   ;;  %s855_s30 = sphi %s923_s30, %s1056_s30  }
   0x4   : > { %p29_p0 = scmp.ge.s32.totalorder %s28_s14, 3  ;;  %p764_p1 = scmp.ge.s32.totalorder %s871_s13, 1 }
   0x5   : > { %p332_p2 = scmp.lt.s32.totalorder %s871_s13, 7 }
   0x6   : > { %s1061_s14 = smov (%p29_p0, %s28_s14), 0  ;;  %s1063_s15 = smov (!%p29_p0, %s31_s15), %s867_s12 }
   0x7   : > { %p333_p3 = pnand %p764_p1, %p332_p2  ;;  %p33_p4 = scmp.ge.s32.totalorder %s1063_s15, 2 }
   0x8   : > { %p388_p5 = scmp.lt.s32.totalorder (!%p333_p3), %s859_s10, 1  ;;  %p390_p6 = scmp.lt.s32.totalorder (!%p333_p3), %s855_s30, 2 }
   0x9   : > { %s1065_s15 = smov (%p33_p4, %s1063_s15), 0  ;;  %336 = sbr.rel (%p333_p3) target bundleno = 778 (0x30a), region = 56 }
   0xe   : > { %v427_v0 = vld [vmem:[%s1050_s4] sm:$0xff]  ;;  %v428_v1 = vld [vmem:[%s1050_s4 + $0x8] sm:$0xff]  ;;  %s1067_s10 = smov (!%p388_p5, %s859_s10), 1  ;;  %s1069_s30 = smov (!%p390_p6, %s855_s30), 2  ;;  %vm435_vm0 = vcmask 130048   ;;  %vm625_vm7 = vcmask 27648  }
   0xf   : > { %v434_v2 = vpack.c.bf16 %v428_v1, %v427_v0  ;;  %494 = vmatpush.msra.mxu2 %v428_v1  ;;  %s785_s20 = smul.u32 6, %s1067_s10  ;;  %s765_s21 = sshll.u32 %s1069_s30, 1  ;;  %v425_v10 = vld [vmem:[%s1049_s3] sm:$0xff]  ;;  %v426_v11 = vld [vmem:[%s1049_s3 + $0x8] sm:$0xff] }
  0x10   : > { %v453_v14 = vpack.c.bf16 %v426_v11, %v425_v10  ;;  %v429_v16 = vld [vmem:[%s1051_s5] sm:$0xff]  ;;  %v430_v22 = vld [vmem:[%s1051_s5 + $0x8] sm:$0xff] }
  0x11   : > { %446 = vmatpush.bf16.msra.mxu0 %v434_v2  ;;  %495 = vmatpush.msra.mxu2 %v427_v0  ;;  %s965_s22 = sadd.s32 %s785_s20, %s765_s21  ;;  %v431_v24 = vld [vmem:[%s1052_s6] sm:$0xff]  ;;  %v432_v33 = vld [vmem:[%s1052_s6 + $0x8] sm:$0xff]  ;;  %s769_s21 = sshll.u32 %s1067_s10, 2 }
  0x12   : > { %s766_s23 = sshll.u32 %s965_s22, 3  ;;  %v599_v36 = vld [vmem:[%s1054_s8 + $0x8] sm:$0xff]  ;;  %v598_v37 = vld [vmem:[%s1054_s8] sm:$0xff]  ;;  %s768_s16 = sshll.u32 %s965_s22, 2 }
  0x13   : > { %s396_s26 = scalar_lea.vmem %s1046_s0, %s766_s23  ;;  %s405_s19 = scalar_lea.vmem %s1047_s1, %s768_s16  ;;  %v574_v1 = vld [vmem:[%s1053_s7] sm:$0xf] }
  0x14   : > { %v971_v3 = vld [vmem:[%s396_s26] sm:$0xff]  ;;  %v973_v4 = vld [vmem:[%s396_s26 + $0x8] sm:$0xff]  ;;  %s409_s25 = scalar_lea.vmem %s1048_s2, %s769_s21  ;;  %s786_s26 = smul.u32 3, %s1067_s10 }
  0x15   : > { %v433_v5 = vpack.c.bf16 %v973_v4, %v971_v3  ;;  %v472_v6 = vmul.f32 %v971_v3, %v971_v3  ;;  %v473_v7 = vmul.f32 %v973_v4, %v973_v4  ;;  %v782_v50 = vld [vmem:[%s405_s19] sm:$0xff]  }
  0x16   : > { %v784_v56 = vunpack.c.h.bf16 %v782_v50  ;;  %v783_v57 = vunpack.c.l.bf16 %v782_v50  ;;  %s415_s27 = sadd.s32 %s786_s26, %s1069_s30 }
  0x17   : > { %771 = vmatmul.msk.bf16.vlgmr.msra.gmra.mxu0 %vm435_vm0, %v433_v5  ;;  %773 = vmatmul.msk.f32.vlgmr.msra.gmra.mxu2 %vm435_vm0, %v472_v6  ;;  %s770_s28 = sshll.u32 %s415_s27, 3 }
  0x18   : > { %s417_s17 = scalar_lea.vmem %s1055_s9, %s770_s28 }
  0x1f   : > { %774 = vmatmul.msk.f32.gmra.mxu2 %vm435_vm0, %v473_v7 }
  0x94   : > { %v448_v8 = vpop.f32.mrf.mxu0 }
  0x9a   : > { %v497_v9 = vpop.f32.mrf.mxu2 }
  0x9c   : > { %v450_v12 = vpop.f32.mrf.mxu0 }
  0x9d   : > { %v454_v13 = vpack.c.bf16 %v450_v12, %v448_v8 }
  0x9f   : > { %465 = vmatpush.bf16.msra.mxu1 %v454_v13 }
  0xa2   : > { %772 = vmatmul.msk.bf16.vlgmr.msra.gmra.mxu1 %vm435_vm0, %v453_v14  ;;  %v500_v15 = vpop.f32.mrf.mxu2 }
  0xa3   : > { %523 = vmatpush.msra.mxu3 %v500_v15  ;;  %617 = vmatpush.msrb.mxu1 %v599_v36 }
  0xa5   : > { %524 = vmatpush.msra.mxu3 %v497_v9  ;;  %618 = vmatpush.msrb.mxu1 %v598_v37 }
  0xa6   : > { %775 = vmatmul.msk.f32.vlgmr.msra.gmra.mxu3 %vm435_vm0, %v425_v10 }
  0xae   : > { %776 = vmatmul.msk.f32.gmra.mxu3 %vm435_vm0, %v426_v11 }
 0x11f   : > { %v467_v17 = vpop.f32.mrf.mxu1 }
 0x120   : > { %v532_v18 = vmul.f32 %v467_v17, %v429_v16 }
 0x122   : > { %v536_v19 = vmul.f32 %v532_v18, %v532_v18  ;;  %v544_v53 = vsub.f32 %v971_v3, %v532_v18  ;;  %v623_v3 = vld [vmem:[%s409_s25] sm:$0xf] }
 0x127   : > { %v469_v23 = vpop.f32.mrf.mxu1 }
 0x128   : > { %v533_v26 = vmul.f32 %v469_v23, %v430_v22 }
 0x129   : > { %v526_v20 = vpop.f32.mrf.mxu3 }
 0x12a   : > { %v534_v21 = vmul.f32 %v526_v20, %v429_v16  ;;  %v537_v30 = vmul.f32 %v533_v26, %v533_v26  ;;  %v545_v55 = vsub.f32 %v973_v4, %v533_v26 }
 0x12c   : > { %v538_v25 = vsub.f32 %v534_v21, %v536_v19 }
 0x12e   : > { %v540_v27 = vmul.f32 %v538_v25, %v431_v24 }
 0x130   : > { %v542_v28 = vmax.f32 %v540_v27, 0.0 }
 0x131   : > { %v529_v29 = vpop.f32.mrf.mxu3 }
 0x132   : > { %v546_v31 = vadd.f32 1e-06, %v542_v28  ;;  %v535_v32 = vmul.f32 %v529_v29, %v430_v22 }
 0x134   : > { %829 = vrsqrt.f32 %v546_v31  ;;  %v539_v34 = vsub.f32 %v535_v32, %v537_v30  ;;  %vm554_vm2 = vweird.f32 %v546_v31 }
 0x136   : > { %v541_v35 = vmul.f32 %v539_v34, %v432_v33 }
 0x138   : > { %v543_v38 = vmax.f32 %v541_v35, 0.0 }
 0x13a   : > { %v830_v39 = vpop.eup %829  ;;  %v547_v40 = vadd.f32 1e-06, %v543_v38 }
 0x13b   : > { %v549_v41 = vmul.f32 %v830_v39, %v546_v31  ;;  %vm555_vm1 = vweird.f32 %v830_v39 }
 0x13c   : > { %831 = vrsqrt.f32 %v547_v40  ;;  %vm556_vm3 = vmor %vm554_vm2, %vm555_vm1  ;;  %vm564_vm5 = vweird.f32 %v547_v40 }
 0x13d   : > { %v550_v42 = vmul.f32 %v830_v39, %v549_v41 }
 0x13f   : > { %v551_v43 = vmul.f32 0.5, %v550_v42 }
 0x141   : > { %v552_v44 = vsub.f32 1.5, %v551_v43 }
 0x142   : > { %v832_v45 = vpop.eup %831 }
 0x143   : > { %v559_v46 = vmul.f32 %v832_v45, %v547_v40  ;;  %v553_v48 = vmul.f32 %v830_v39, %v552_v44  ;;  %vm565_vm4 = vweird.f32 %v832_v45 }
 0x144   : > { %vm566_vm6 = vmor %vm564_vm5, %vm565_vm4 }
 0x145   : > { %v560_v47 = vmul.f32 %v832_v45, %v559_v46  ;;  %v557_v52 = vsel %vm556_vm3, %v830_v39, %v553_v48 }
 0x146   : > { %v568_v58 = vmul.f32 %v557_v52, %v544_v53 }
 0x147   : > { %v561_v49 = vmul.f32 0.5, %v560_v47 }
 0x148   : > { %v570_v62 = vsub.f32 %v568_v58, %v783_v57 }
 0x149   : > { %v562_v51 = vsub.f32 1.5, %v561_v49 }
 0x14a   : > { %v572_v0 = vand.u32 2147483647, %v570_v62 }
 0x14b   : > { %v563_v54 = vmul.f32 %v832_v45, %v562_v51 }
 0x14d   : > { %v567_v59 = vsel %vm566_vm6, %v832_v45, %v563_v54 }
 0x14e   : > { %v569_v60 = vmul.f32 %v567_v59, %v545_v55 }
 0x150   : > { %v571_v61 = vsub.f32 %v569_v60, %v784_v56 }
 0x152   : > { %v573_v63 = vand.u32 2147483647, %v571_v61 }
 0x154   : > { %592 = vmatpush.msrb.mxu0 %v573_v63 }
 0x156   : > { %593 = vmatpush.msrb.mxu0 %v572_v0 }
 0x157   : > { %777 = vmatmul.msk.f32.vlgmr.msrb.gmra.mxu0 %vm435_vm0, %v574_v1 }
 0x1d4   : > { %v595_v2 = vpop.f32.mrf.mxu0 }
 0x1d5   : > { %778 = vmatmul.msk.f32.vlgmr.msrb.gmra.mxu1 %vm435_vm0, %v595_v2 }
 0x252   : > { %v620_v4 = vpop.f32.mrf.mxu1 }
 0x253   : > { %v624_v5 = vmul.f32 %v623_v3, %v620_v4 }
 0x255   : > { %v626_v6 = vsel %vm625_vm7, %v624_v5, 0.0 }
 0x256   : > { %627 = vadd.xlane.f32.xlu0 %v626_v6 }
 0x2c9   : > { %v628_v7 = vpop.xlane.xlu0 %627 }
 0x2ca   : > { %v629_v8 = vrot.slane %v628_v7, 4 }
 0x2cc   : > { %v630_v9 = vadd.f32 %v629_v8, %v628_v7 }
 0x2ce   : > { %v631_v10 = vrot.slane %v630_v9, 2 }
 0x2d0   : > { %v632_v11 = vadd.f32 %v631_v10, %v630_v9 }
 0x2d2   : > { %v633_v12 = vrot.slane %v632_v11, 1 }
 0x2d4   : > { %v634_v13 = vadd.f32 %v633_v12, %v632_v11 }
 0x2d6   : > { %787 = vpush %v634_v13 }
 0x307   : > { %s788_s18 = spop %787 }
 0x308   : > { %v636_v14 = vstv %s788_s18 }
 0x309   : > { %637 = vst [vmem:[%s417_s17] sm:$0xff] %v636_v14 }
 0x30a PF: > { %s19_s13 = sadd.s32 1, %s871_s13   ;;  %s1056_s30 = smov %s863_s11 }
 0x30b   : > { %p16_p7 = scmp.ge.s32.totalorder %s19_s13, 8   ;;  %s1057_s10 = smov %s867_s12 }
 0x30c   : > { %s1058_s11 = smov %s1061_s14  ;;  %s1059_s12 = smov %s1065_s15 }
 0x30d   :  { %18 = sbr.rel (!%p16_p7) target bundleno = 3 (0x3), region = 92 }

</bundles_post_ra>
